<compile_context>
chip_gen: v5e
topology: v5e:2x2
jax: 0.10.0
libtpu: 0.0.40
codegen_flags: <defaults>
</compile_context>

<pallas_src>
import math
import numpy as np
import jax
import jax.numpy as jnp
from jax.experimental import pallas as pl
from jax.experimental.pallas import tpu as pltpu


# ----------------------------- config ---------------------------------------
CONFIG = dict(
    sampling_rate=16000,
    win_size=64,          # n_fft == win_length
    hop_size=16,
    n_mel_channels=16,
    mel_fmin=0.0,
    mel_fmax=8000.0,
)

_N_REIM = 256      # packed re|im lane width: cos at lanes [0, n_freq), sin at [128, 128+n_freq)
_N_MEL_PAD = 128   # mel lanes padded to a full vreg lane width (padded lanes cancel in the L1)
_TM_CAP = 1024     # frames per grid tile (2*TM matmul rows after real|fake stacking)


def _round_up(x, m):
    return ((x + m - 1) // m) * m


# ------------------------ deterministic "parameters" ------------------------
def _hann_window(n):
    # torch.hann_window(N, periodic=True)
    k = np.arange(n, dtype=np.float64)
    return 0.5 * (1.0 - np.cos(2.0 * math.pi * k / n))


def _melscale_fbanks(n_freqs, f_min, f_max, n_mels, sample_rate):
    # torchaudio.functional.melscale_fbanks, mel_scale="htk", norm=None
    all_freqs = np.linspace(0.0, sample_rate // 2, n_freqs)
    m_min = 2595.0 * np.log10(1.0 + f_min / 700.0)
    m_max = 2595.0 * np.log10(1.0 + f_max / 700.0)
    m_pts = np.linspace(m_min, m_max, n_mels + 2)
    f_pts = 700.0 * (10.0 ** (m_pts / 2595.0) - 1.0)
    f_diff = f_pts[1:] - f_pts[:-1]
    slopes = f_pts[None, :] - all_freqs[:, None]          # (n_freqs, n_mels + 2)
    down = -slopes[:, :-2] / f_diff[:-1]
    up = slopes[:, 2:] / f_diff[1:]
    return np.maximum(0.0, np.minimum(down, up))          # (n_freqs, n_mels)


def _build_weights(n_fft, n_mels, f_min, f_max, sample_rate):
    """Window-folded packed DFT weight (n_fft, 256) and stacked mel filterbank (256, 128)."""
    n_freqs = n_fft // 2 + 1
    win = _hann_window(n_fft)[:, None]                    # (n_fft, 1)
    n = np.arange(n_fft, dtype=np.float64)[:, None]
    k = np.arange(n_freqs, dtype=np.float64)[None, :]
    ang = 2.0 * math.pi * n * k / n_fft
    w_cos = win * np.cos(ang)                             # window folded in (linear in contraction)
    w_sin = win * (-np.sin(ang))
    W = np.zeros((n_fft, _N_REIM), dtype=np.float64)
    W[:, :n_freqs] = w_cos
    W[:, 128:128 + n_freqs] = w_sin

    fb = _melscale_fbanks(n_freqs, f_min, f_max, n_mels, sample_rate)   # (n_freqs, n_mels)
    FB = np.zeros((_N_REIM, _N_MEL_PAD), dtype=np.float64)
    FB[:n_freqs, :n_mels] = fb                            # picks up re^2
    FB[128:128 + n_freqs, :n_mels] = fb                   # picks up im^2
    return W.astype(np.float32), FB.astype(np.float32)


# ------------------------------- Pallas kernel -------------------------------
def _mel_l1_kernel(frames_ref, w_ref, fb_ref, out_ref):
    # frames_ref : (2, TM, n_fft) bf16 -- [0] = real frames, [1] = fake frames
    # w_ref      : (n_fft, 256)   bf16 -- windowed cos|sin packed at lane offsets 0 / 128
    # fb_ref     : (256, 128)     f32  -- mel filterbank rows duplicated at offsets 0 / 128
    # out_ref    : (1, 8, 128)    f32  -- per-tile partial L1 sums (summed in wrapper)
    two, tm, n_fft = frames_ref.shape
    frames = frames_ref[...].reshape(two * tm, n_fft)     # collapse real|fake -> one matmul chain

    reim = jnp.dot(frames, w_ref[...], preferred_element_type=jnp.float32)   # (2TM, 256)
    power = reim * reim                                                       # re^2 | im^2
    mel = jnp.dot(power, fb_ref[...], preferred_element_type=jnp.float32)     # (2TM, 128)
    logmel = jnp.log(jnp.maximum(mel, 1e-5))                                  # log(clamp(., 1e-5))

    diff = jnp.abs(logmel[tm:, :] - logmel[:tm, :])       # (TM, 128); split at aligned boundary
    # Partial-sum the tile into one (8, 128) block (vreg-aligned; no cross-lane reduce needed).
    out_ref[0] = diff.reshape(tm // 8, 8, _N_MEL_PAD).sum(axis=0)


# ------------------------------- wrapper -------------------------------------
def mel_spectrogram_loss(real_audio, fake_audio, cfg=CONFIG):
    n_fft = cfg["win_size"]
    hop = cfg["hop_size"]
    n_mels = cfg["n_mel_channels"]
    assert n_fft % hop == 0, "framing-by-reshape requires n_fft % hop == 0"
    ratio = n_fft // hop
    pad = n_fft // 2
    B, _, T = real_audio.shape

    n_frames = 1 + (T + 2 * pad - n_fft) // hop
    n_hops = n_frames + ratio - 1
    M = B * n_frames
    TM = _TM_CAP if M >= _TM_CAP else _round_up(M, 16)    # bf16 sublane tile = 16
    M_pad = _round_up(M, TM)
    G = M_pad // TM

    def frames_of(audio):
        x = audio[:, 0, :].astype(jnp.float32)            # squeeze(1): (B, 1, T) -> (B, T)
        xp = jnp.pad(x, ((0, 0), (pad, pad)), mode="reflect")   # center=True, reflect pad
        hops = xp[:, :n_hops * hop].reshape(B, n_hops, hop)
        # frame f = hop rows [f, f+ratio) -> contiguous slices + concat (no XLA gather)
        f = jnp.concatenate([hops[:, k:k + n_frames, :] for k in range(ratio)], axis=-1)
        f = f.reshape(M, n_fft)
        # zero-padded frames clamp to 1e-5 on both sides -> contribute 0 to the L1 sum
        return jnp.pad(f, ((0, M_pad - M), (0, 0)))

    stacked = jnp.stack([frames_of(real_audio), frames_of(fake_audio)], axis=0)
    stacked = stacked.astype(jnp.bfloat16)                # (2, M_pad, n_fft)
    # TODO(synk): build frames in-kernel from the padded audio (strided reads) to avoid the
    # ratio-x duplicated frame bytes in HBM for very long audio.

    W_np, FB_np = _build_weights(n_fft, n_mels, cfg["mel_fmin"], cfg["mel_fmax"],
                                 cfg["sampling_rate"])
    W = jnp.asarray(W_np, dtype=jnp.bfloat16)             # (n_fft, 256)
    FB = jnp.asarray(FB_np, dtype=jnp.float32)            # (256, 128)

    grid_spec = pltpu.PrefetchScalarGridSpec(
        num_scalar_prefetch=0,
        grid=(G,),
        in_specs=[
            pl.BlockSpec((2, TM, n_fft), lambda i: (0, i, 0)),        # frame tiles, pipelined
            pl.BlockSpec((n_fft, _N_REIM), lambda i: (0, 0)),         # resident weights
            pl.BlockSpec((_N_REIM, _N_MEL_PAD), lambda i: (0, 0)),    # resident filterbank
        ],
        out_specs=pl.BlockSpec((1, 8, 128), lambda i: (i, 0, 0)),     # per-tile partial sums
    )

    partial = pl.pallas_call(
        _mel_l1_kernel,
        out_shape=jax.ShapeDtypeStruct((G, 8, 128), jnp.float32),
        grid_spec=grid_spec,
        compiler_params=pltpu.CompilerParams(
            dimension_semantics=("parallel",),            # independent tiles -> 2 TCs on v7x
            vmem_limit_bytes=32 * 1024 * 1024,            # explicit headroom for v7x (64 MiB VMEM)
        ),
    )(stacked, W, FB)

    # F.l1_loss(reduction='mean') over the true (B, n_mels, n_frames) mel elements.
    return jnp.sum(partial) / float(B * n_frames * n_mels)


# --------------------------------- main --------------------------------------
if __name__ == "__main__":
    key = jax.random.PRNGKey(0)
    k_r, k_f = jax.random.split(key)
    B, T = 2, 256
    real_audio = jax.random.normal(k_r, (B, 1, T), dtype=jnp.float32)
    fake_audio = jax.random.normal(k_f, (B, 1, T), dtype=jnp.float32)

    loss = jax.jit(mel_spectrogram_loss)(real_audio, fake_audio)
    jax.block_until_ready(loss)
    assert jnp.isfinite(loss), "loss is not finite"
    print("KERNEL_OK")
</pallas_src>

<mosaic_0001>
module attributes {stable_mosaic.version = 11 : i64} {
  func.func @_mel_l1_kernel(%arg0: i32, %arg1: memref<2x48x64xbf16, #tpu.memory_space<vmem>>, %arg2: memref<64x256xbf16, #tpu.memory_space<vmem>>, %arg3: memref<256x128xf32, #tpu.memory_space<vmem>>, %arg4: memref<1x8x128xf32, #tpu.memory_space<vmem>>) attributes {dimension_semantics = [#tpu.dimension_semantics<parallel>], iteration_bounds = array<i64: 1>, scalar_prefetch = 0 : i64, scratch_operands = 0 : i64, tpu.core_type = #tpu.core_type<tc>, window_params = [{transform_indices = @transform_0, window_bounds = array<i64: 2, 48, 64>}, {pipeline_mode = #tpu.pipeline_mode<synchronous>, transform_indices = @transform_1, window_bounds = array<i64: 64, 256>}, {pipeline_mode = #tpu.pipeline_mode<synchronous>, transform_indices = @transform_2, window_bounds = array<i64: 256, 128>}, {transform_indices = @transform_3, window_bounds = array<i64: 1, 8, 128>}]} {
    %c0 = arith.constant 0 : index
    %c0_0 = arith.constant 0 : index
    %c0_1 = arith.constant 0 : index
    %0 = vector.load %arg1[%c0, %c0_0, %c0_1] : memref<2x48x64xbf16, #tpu.memory_space<vmem>>, vector<2x48x64xbf16>
    %1 = vector.shape_cast %0 : vector<2x48x64xbf16> to vector<96x64xbf16>
    %c0_2 = arith.constant 0 : index
    %c0_3 = arith.constant 0 : index
    %2 = vector.load %arg2[%c0_2, %c0_3] : memref<64x256xbf16, #tpu.memory_space<vmem>>, vector<64x256xbf16>
    %cst = arith.constant dense<0.000000e+00> : vector<96x256xf32>
    %3 = tpu.matmul %1, %2, %cst {dimension_numbers = #tpu.dot_dimension_numbers<[1], [0], [0], [1], [0, 0, 1, 1], [], []>} : vector<96x64xbf16>, vector<64x256xbf16>, vector<96x256xf32> -> vector<96x256xf32>
    %4 = arith.mulf %3, %3 : vector<96x256xf32>
    %c0_4 = arith.constant 0 : index
    %c0_5 = arith.constant 0 : index
    %5 = vector.load %arg3[%c0_4, %c0_5] : memref<256x128xf32, #tpu.memory_space<vmem>>, vector<256x128xf32>
    %cst_6 = arith.constant dense<0.000000e+00> : vector<96x128xf32>
    %6 = tpu.matmul %4, %5, %cst_6 {dimension_numbers = #tpu.dot_dimension_numbers<[1], [0], [0], [1], [0, 0, 1, 1], [], []>} : vector<96x256xf32>, vector<256x128xf32>, vector<96x128xf32> -> vector<96x128xf32>
    %cst_7 = arith.constant 9.99999974E-6 : f32
    %7 = vector.broadcast %cst_7 : f32 to vector<96x128xf32>
    %8 = arith.maximumf %6, %7 : vector<96x128xf32>
    %9 = math.log %8 : vector<96x128xf32>
    %10 = vector.extract_strided_slice %9 {offsets = [48, 0], sizes = [48, 128], strides = [1, 1]} : vector<96x128xf32> to vector<48x128xf32>
    %11 = vector.extract_strided_slice %9 {offsets = [0, 0], sizes = [48, 128], strides = [1, 1]} : vector<96x128xf32> to vector<48x128xf32>
    %12 = arith.subf %10, %11 : vector<48x128xf32>
    %13 = math.absf %12 : vector<48x128xf32>
    %14 = vector.shape_cast %13 : vector<48x128xf32> to vector<6x8x128xf32>
    %cst_8 = arith.constant dense<0.000000e+00> : vector<8x128xf32>
    %15 = vector.multi_reduction <add>, %14, %cst_8 [0] : vector<6x8x128xf32> to vector<8x128xf32>
    %c0_9 = arith.constant 0 : index
    %c0_10 = arith.constant 0 : index
    %c0_11 = arith.constant 0 : index
    %16 = vector.load %arg4[%c0_9, %c0_10, %c0_11] : memref<1x8x128xf32, #tpu.memory_space<vmem>>, vector<1x8x128xf32>
    %17 = vector.shape_cast %16 : vector<1x8x128xf32> to vector<8x128xf32>
    %18 = vector.shape_cast %15 : vector<8x128xf32> to vector<1x8x128xf32>
    tpu.vector_store %arg4[%c0_9, %c0_10, %c0_11], %18 {strides = array<i32>} : memref<1x8x128xf32, #tpu.memory_space<vmem>>, vector<1x8x128xf32>,
    return
  }
  func.func @transform_0(%arg0: i32) -> (i32, i32, i32) {
    %c0_i32 = arith.constant 0 : i32
    %c0_i32_0 = arith.constant 0 : i32
    %c0_i32_1 = arith.constant 0 : i32
    return %c0_i32, %arg0, %c0_i32_0 : i32, i32, i32
  }
  func.func @transform_1(%arg0: i32) -> (i32, i32) {
    %c0_i32 = arith.constant 0 : i32
    %c0_i32_0 = arith.constant 0 : i32
    %c0_i32_1 = arith.constant 0 : i32
    return %c0_i32, %c0_i32_0 : i32, i32
  }
  func.func @transform_2(%arg0: i32) -> (i32, i32) {
    %c0_i32 = arith.constant 0 : i32
    %c0_i32_0 = arith.constant 0 : i32
    %c0_i32_1 = arith.constant 0 : i32
    return %c0_i32, %c0_i32_0 : i32, i32
  }
  func.func @transform_3(%arg0: i32) -> (i32, i32, i32) {
    %c0_i32 = arith.constant 0 : i32
    %c0_i32_0 = arith.constant 0 : i32
    %c0_i32_1 = arith.constant 0 : i32
    return %arg0, %c0_i32, %c0_i32_0 : i32, i32, i32
  }
}

</mosaic_0001>

<bundles_post_ra>
// kernel: mel_spectrogram_loss.1
= control target key start
LH: loop header
LB: loop body
LE: loop exit
PB: predicated region body
PF: predicated region fallthrough
CT: control target
= control target key end

     0   :  { %vm105_vm0 = vcmask 523264   ;;  %s757_s1 = inlined_call_operand.vmem [shape: bf16[64,256], index: 1, kind: input, shape index: {}]   ;;  %s758_s0 = inlined_call_operand.vmem [shape: bf16[2,48,64], index: 0, kind: input, shape index: {}]   ;;  %s759_s2 = inlined_call_operand.vmem [shape: f32[256,128], index: 2, kind: input, shape index: {}]   ;;  %s760_s3 = inlined_call_operand.vmem [shape: f32[1,8,128], index: 3, kind: output, shape index: {}]  }
   0x1   :  { %v472_v0 = vld [vmem:[%s757_s1 + $0x30] sm:$0xf]  ;;  %v503_v1 = vld [vmem:[%s757_s1 + $0x34] sm:$0xf0]  ;;  %v502_v2 = vld [vmem:[%s757_s1 + $0x34] sm:$0xf] }
   0x2   :  { %v473_v3 = vor.u32 %v503_v1, %v472_v0  ;;  %v474_v4 = vld [vmem:[%s757_s1 + $0x38] sm:$0xf0]  ;;  %v464_v5 = vld [vmem:[%s757_s1 + $0x20] sm:$0xf]  ;;  %v501_v6 = vld [vmem:[%s757_s1 + $0x24] sm:$0xf0] }
   0x3   :  { %v477_v7 = vor.u32 %v502_v2, %v474_v4  ;;  %v500_v8 = vld [vmem:[%s757_s1 + $0x24] sm:$0xf]  ;;  %v466_v9 = vld [vmem:[%s757_s1 + $0x28] sm:$0xf0]  ;;  %v465_v10 = vor.u32 %v501_v6, %v464_v5  ;;  %v456_v12 = vld [vmem:[%s757_s1 + $0x10] sm:$0xf] }
   0x4   :  { %128 = vmatpush.bf16.msra.mxu0 %v473_v3  ;;  %v469_v11 = vor.u32 %v500_v8, %v466_v9  ;;  %v499_v13 = vld [vmem:[%s757_s1 + $0x14] sm:$0xf0]  ;;  %v498_v14 = vld [vmem:[%s757_s1 + $0x14] sm:$0xf]  ;;  %v458_v15 = vld [vmem:[%s757_s1 + $0x18] sm:$0xf0] }
   0x5   :  { %167 = vmatpush.bf16.msra.mxu1 %v477_v7  ;;  %v457_v16 = vor.u32 %v499_v13, %v456_v12  ;;  %v461_v17 = vor.u32 %v498_v14, %v458_v15  ;;  %v448_v18 = vld [vmem:[%s757_s1] sm:$0xf]  ;;  %v497_v19 = vld [vmem:[%s757_s1 + $0x4] sm:$0xf0]  ;;  %v496_v20 = vld [vmem:[%s757_s1 + $0x4] sm:$0xf] }
   0x6   :  { %v450_v21 = vld [vmem:[%s757_s1 + $0x8] sm:$0xf0]  ;;  %v449_v22 = vor.u32 %v497_v19, %v448_v18  ;;  %v490_v24 = vld [vmem:[%s758_s0] sm:$0xff]  ;;  %v492_v26 = vld [vmem:[%s758_s0 + $0x10] sm:$0xff] }
   0x7   :  { %v453_v23 = vor.u32 %v496_v20, %v450_v21  ;;  %v491_v25 = vld [vmem:[%s758_s0 + $0x8] sm:$0xff]  ;;  %v493_v27 = vld [vmem:[%s758_s0 + $0x18] sm:$0xff]  ;;  %v240_v30 = vld [vmem:[%s759_s2 + $0x70] sm:$0xff] }
   0x8   :  { %129 = vmatpush.bf16.msra.mxu0 %v465_v10  ;;  %v241_v28 = vld [vmem:[%s759_s2 + $0x78] sm:$0xff]  ;;  %v256_v31 = vld [vmem:[%s759_s2 + $0xf0] sm:$0xff]  ;;  %v239_v32 = vld [vmem:[%s759_s2 + $0x68] sm:$0xff] }
   0x9   :  { %168 = vmatpush.bf16.msra.mxu1 %v469_v11  ;;  %v257_v29 = vld [vmem:[%s759_s2 + $0xf8] sm:$0xff]  ;;  %v255_v33 = vld [vmem:[%s759_s2 + $0xe8] sm:$0xff]  ;;  %504 = vmatpush.msra.mxu2 %v241_v28  ;;  %v238_v34 = vld [vmem:[%s759_s2 + $0x60] sm:$0xff] }
   0xa   :  { %520 = vmatpush.msra.mxu3 %v257_v29  ;;  %v254_v35 = vld [vmem:[%s759_s2 + $0xe0] sm:$0xff]  ;;  %v237_v36 = vld [vmem:[%s759_s2 + $0x58] sm:$0xff]  ;;  %v236_v38 = vld [vmem:[%s759_s2 + $0x50] sm:$0xff] }
   0xb   :  { %505 = vmatpush.msra.mxu2 %v240_v30  ;;  %v253_v37 = vld [vmem:[%s759_s2 + $0xd8] sm:$0xff]  ;;  %v252_v39 = vld [vmem:[%s759_s2 + $0xd0] sm:$0xff]  ;;  %v235_v40 = vld [vmem:[%s759_s2 + $0x48] sm:$0xff] }
   0xc   :  { %130 = vmatpush.bf16.msra.mxu0 %v457_v16  ;;  %521 = vmatpush.msra.mxu3 %v256_v31  ;;  %v251_v41 = vld [vmem:[%s759_s2 + $0xc8] sm:$0xff]  ;;  %v494_v42 = vld [vmem:[%s758_s0 + $0x20] sm:$0xff]  ;;  %v249_v45 = vld [vmem:[%s759_s2 + $0xb8] sm:$0xff] }
   0xd   :  { %169 = vmatpush.bf16.msra.mxu1 %v461_v17  ;;  %506 = vmatpush.msra.mxu2 %v239_v32  ;;  %v250_v43 = vld [vmem:[%s759_s2 + $0xc0] sm:$0xff]  ;;  %v233_v46 = vld [vmem:[%s759_s2 + $0x38] sm:$0xff]  ;;  %v248_v47 = vld [vmem:[%s759_s2 + $0xb0] sm:$0xff] }
   0xe   :  { %522 = vmatpush.msra.mxu3 %v255_v33  ;;  %v234_v44 = vld [vmem:[%s759_s2 + $0x40] sm:$0xff]  ;;  %v232_v48 = vld [vmem:[%s759_s2 + $0x30] sm:$0xff]  ;;  %v247_v49 = vld [vmem:[%s759_s2 + $0xa8] sm:$0xff] }
   0xf   :  { %507 = vmatpush.msra.mxu2 %v238_v34  ;;  %v231_v50 = vld [vmem:[%s759_s2 + $0x28] sm:$0xff]  ;;  %v246_v51 = vld [vmem:[%s759_s2 + $0xa0] sm:$0xff]  ;;  %v245_v53 = vld [vmem:[%s759_s2 + $0x98] sm:$0xff] }
  0x10   :  { %131 = vmatpush.bf16.msra.mxu0 %v449_v22  ;;  %523 = vmatpush.msra.mxu3 %v254_v35  ;;  %v230_v52 = vld [vmem:[%s759_s2 + $0x20] sm:$0xff]  ;;  %v229_v54 = vld [vmem:[%s759_s2 + $0x18] sm:$0xff]  ;;  %v244_v55 = vld [vmem:[%s759_s2 + $0x90] sm:$0xff] }
  0x11   :  { %170 = vmatpush.bf16.msra.mxu1 %v453_v23  ;;  %508 = vmatpush.msra.mxu2 %v237_v36  ;;  %v228_v56 = vld [vmem:[%s759_s2 + $0x10] sm:$0xff]  ;;  %v495_v57 = vld [vmem:[%s758_s0 + $0x28] sm:$0xff]  ;;  %v226_v60 = vld [vmem:[%s759_s2] sm:$0xff] }
  0x12   :  { %524 = vmatpush.msra.mxu3 %v253_v37  ;;  %v227_v58 = vld [vmem:[%s759_s2 + $0x8] sm:$0xff]  ;;  %v242_v61 = vld [vmem:[%s759_s2 + $0x80] sm:$0xff] }
  0x13   :  { %478 = vmatmul.msk.bf16.vlgmr.msra.gmra.mxu0 %vm105_vm0, %v490_v24  ;;  %509 = vmatpush.msra.mxu2 %v236_v38  ;;  %v243_v59 = vld [vmem:[%s759_s2 + $0x88] sm:$0xff] }
  0x14   :  { %484 = vmatmul.msk.bf16.vlgmr.msra.gmra.mxu1 %vm105_vm0, %v490_v24  ;;  %258 = vmatpush.msrb.mxu0 %v241_v28 }
  0x15   :  { %311 = vmatpush.msrb.mxu1 %v257_v29  ;;  %525 = vmatpush.msra.mxu3 %v252_v39 }
  0x16   :  { %259 = vmatpush.msrb.mxu0 %v240_v30  ;;  %510 = vmatpush.msra.mxu2 %v235_v40 }
  0x17   :  { %312 = vmatpush.msrb.mxu1 %v256_v31  ;;  %526 = vmatpush.msra.mxu3 %v251_v41 }
  0x18   :  { %260 = vmatpush.msrb.mxu0 %v239_v32  ;;  %511 = vmatpush.msra.mxu2 %v234_v44 }
  0x19   :  { %313 = vmatpush.msrb.mxu1 %v255_v33  ;;  %527 = vmatpush.msra.mxu3 %v250_v43 }
  0x1a   :  { %261 = vmatpush.msrb.mxu0 %v238_v34  ;;  %512 = vmatpush.msra.mxu2 %v233_v46 }
  0x1b   :  { %314 = vmatpush.msrb.mxu1 %v254_v35  ;;  %528 = vmatpush.msra.mxu3 %v249_v45 }
  0x1c   :  { %262 = vmatpush.msrb.mxu0 %v237_v36  ;;  %513 = vmatpush.msra.mxu2 %v232_v48 }
  0x1d   :  { %315 = vmatpush.msrb.mxu1 %v253_v37  ;;  %529 = vmatpush.msra.mxu3 %v248_v47 }
  0x1e   :  { %263 = vmatpush.msrb.mxu0 %v236_v38  ;;  %514 = vmatpush.msra.mxu2 %v231_v50 }
  0x1f   :  { %316 = vmatpush.msrb.mxu1 %v252_v39  ;;  %530 = vmatpush.msra.mxu3 %v247_v49 }
  0x20   :  { %264 = vmatpush.msrb.mxu0 %v235_v40  ;;  %515 = vmatpush.msra.mxu2 %v230_v52 }
  0x21   :  { %317 = vmatpush.msrb.mxu1 %v251_v41  ;;  %531 = vmatpush.msra.mxu3 %v246_v51 }
  0x22   :  { %265 = vmatpush.msrb.mxu0 %v234_v44  ;;  %516 = vmatpush.msra.mxu2 %v229_v54 }
  0x23   :  { %479 = vmatmul.msk.bf16.gmra.mxu0 %vm105_vm0, %v491_v25  ;;  %318 = vmatpush.msrb.mxu1 %v250_v43 }
  0x24   :  { %485 = vmatmul.msk.bf16.gmra.mxu1 %vm105_vm0, %v491_v25  ;;  %266 = vmatpush.msrb.mxu0 %v233_v46 }
  0x25   :  { %319 = vmatpush.msrb.mxu1 %v249_v45  ;;  %532 = vmatpush.msra.mxu3 %v245_v53 }
  0x26   :  { %267 = vmatpush.msrb.mxu0 %v232_v48  ;;  %517 = vmatpush.msra.mxu2 %v228_v56 }
  0x27   :  { %320 = vmatpush.msrb.mxu1 %v248_v47  ;;  %533 = vmatpush.msra.mxu3 %v244_v55 }
  0x28   :  { %268 = vmatpush.msrb.mxu0 %v231_v50  ;;  %518 = vmatpush.msra.mxu2 %v227_v58 }
  0x29   :  { %321 = vmatpush.msrb.mxu1 %v247_v49  ;;  %534 = vmatpush.msra.mxu3 %v243_v59 }
  0x2a   :  { %269 = vmatpush.msrb.mxu0 %v230_v52  ;;  %519 = vmatpush.msra.mxu2 %v226_v60 }
  0x2b   :  { %322 = vmatpush.msrb.mxu1 %v246_v51  ;;  %535 = vmatpush.msra.mxu3 %v242_v61 }
  0x2c   :  { %270 = vmatpush.msrb.mxu0 %v229_v54 }
  0x2d   :  { %323 = vmatpush.msrb.mxu1 %v245_v53 }
  0x2e   :  { %271 = vmatpush.msrb.mxu0 %v228_v56 }
  0x2f   :  { %324 = vmatpush.msrb.mxu1 %v244_v55 }
  0x30   :  { %272 = vmatpush.msrb.mxu0 %v227_v58 }
  0x31   :  { %325 = vmatpush.msrb.mxu1 %v243_v59 }
  0x32   :  { %273 = vmatpush.msrb.mxu0 %v226_v60 }
  0x33   :  { %480 = vmatmul.msk.bf16.gmra.mxu0 %vm105_vm0, %v492_v26  ;;  %326 = vmatpush.msrb.mxu1 %v242_v61 }
  0x34   :  { %486 = vmatmul.msk.bf16.gmra.mxu1 %vm105_vm0, %v492_v26 }
  0x43   :  { %481 = vmatmul.msk.bf16.gmra.mxu0 %vm105_vm0, %v493_v27 }
  0x44   :  { %487 = vmatmul.msk.bf16.gmra.mxu1 %vm105_vm0, %v493_v27 }
  0x53   :  { %482 = vmatmul.msk.bf16.gmra.mxu0 %vm105_vm0, %v494_v42 }
  0x54   :  { %488 = vmatmul.msk.bf16.gmra.mxu1 %vm105_vm0, %v494_v42 }
  0x63   :  { %483 = vmatmul.msk.bf16.gmra.mxu0 %vm105_vm0, %v495_v57 }
  0x64   :  { %489 = vmatmul.msk.bf16.gmra.mxu1 %vm105_vm0, %v495_v57 }
  0x90   :  { %v133_v62 = vpop.f32.mrf.mxu0 }
  0x91   :  { %v202_v63 = vmul.f32 %v133_v62, %v133_v62  ;;  %v172_v0 = vpop.f32.mrf.mxu1 }
  0x92   :  { %v203_v1 = vmul.f32 %v172_v0, %v172_v0 }
  0x93   :  { %274 = vmatmul.f32.vlgmr.msrb.gmra.mxu0 %v202_v63 }
  0x94   :  { %327 = vmatmul.f32.vlgmr.msrb.gmra.mxu1 %v203_v1 }
  0x98   :  { %v135_v2 = vpop.f32.mrf.mxu0 }
  0x99   :  { %v204_v3 = vmul.f32 %v135_v2, %v135_v2  ;;  %v174_v4 = vpop.f32.mrf.mxu1 }
  0x9a   :  { %v205_v5 = vmul.f32 %v174_v4, %v174_v4 }
  0x9b   :  { %277 = vmatmul.f32.vlgmr.msra.gmra.mxu2 %v204_v3 }
  0x9c   :  { %330 = vmatmul.f32.vlgmr.msra.gmra.mxu3 %v205_v5 }
  0xa0   :  { %v138_v6 = vpop.f32.mrf.mxu0 }
  0xa1   :  { %v206_v7 = vmul.f32 %v138_v6, %v138_v6  ;;  %v177_v8 = vpop.f32.mrf.mxu1 }
  0xa2   :  { %v207_v9 = vmul.f32 %v177_v8, %v177_v8 }
  0xa3   :  { %280 = vmatmul.f32.gmra.mxu2 %v206_v7 }
  0xa4   :  { %333 = vmatmul.f32.gmra.mxu3 %v207_v9 }
  0xa8   :  { %v140_v10 = vpop.f32.mrf.mxu0 }
  0xa9   :  { %v208_v11 = vmul.f32 %v140_v10, %v140_v10  ;;  %v179_v12 = vpop.f32.mrf.mxu1 }
  0xaa   :  { %v209_v13 = vmul.f32 %v179_v12, %v179_v12 }
  0xab   :  { %283 = vmatmul.f32.gmra.mxu2 %v208_v11 }
  0xac   :  { %336 = vmatmul.f32.gmra.mxu3 %v209_v13 }
  0xb0   :  { %v143_v14 = vpop.f32.mrf.mxu0 }
  0xb1   :  { %v210_v15 = vmul.f32 %v143_v14, %v143_v14  ;;  %v182_v16 = vpop.f32.mrf.mxu1 }
  0xb2   :  { %v211_v17 = vmul.f32 %v182_v16, %v182_v16 }
  0xb3   :  { %286 = vmatmul.f32.gmra.mxu2 %v210_v15 }
  0xb4   :  { %339 = vmatmul.f32.gmra.mxu3 %v211_v17 }
  0xb8   :  { %v145_v18 = vpop.f32.mrf.mxu0 }
  0xb9   :  { %v212_v19 = vmul.f32 %v145_v18, %v145_v18  ;;  %v184_v20 = vpop.f32.mrf.mxu1 }
  0xba   :  { %v213_v21 = vmul.f32 %v184_v20, %v184_v20 }
  0xbb   :  { %289 = vmatmul.f32.gmra.mxu2 %v212_v19 }
  0xbc   :  { %342 = vmatmul.f32.gmra.mxu3 %v213_v21 }
  0xc0   :  { %v148_v22 = vpop.f32.mrf.mxu0 }
  0xc1   :  { %v214_v23 = vmul.f32 %v148_v22, %v148_v22  ;;  %v187_v24 = vpop.f32.mrf.mxu1 }
  0xc2   :  { %v215_v25 = vmul.f32 %v187_v24, %v187_v24 }
  0xc3   :  { %292 = vmatmul.f32.gmra.mxu2 %v214_v23 }
  0xc4   :  { %345 = vmatmul.f32.gmra.mxu3 %v215_v25 }
  0xc8   :  { %v150_v26 = vpop.f32.mrf.mxu0 }
  0xc9   :  { %v216_v27 = vmul.f32 %v150_v26, %v150_v26  ;;  %v189_v28 = vpop.f32.mrf.mxu1 }
  0xca   :  { %v217_v29 = vmul.f32 %v189_v28, %v189_v28 }
  0xcb   :  { %295 = vmatmul.f32.gmra.mxu2 %v216_v27 }
  0xcc   :  { %348 = vmatmul.f32.gmra.mxu3 %v217_v29 }
  0xd0   :  { %v153_v30 = vpop.f32.mrf.mxu0 }
  0xd1   :  { %v218_v31 = vmul.f32 %v153_v30, %v153_v30  ;;  %v192_v32 = vpop.f32.mrf.mxu1 }
  0xd2   :  { %v219_v33 = vmul.f32 %v192_v32, %v192_v32 }
  0xd3   :  { %298 = vmatmul.f32.gmra.mxu2 %v218_v31 }
  0xd4   :  { %351 = vmatmul.f32.gmra.mxu3 %v219_v33 }
  0xd8   :  { %v155_v34 = vpop.f32.mrf.mxu0 }
  0xd9   :  { %v220_v35 = vmul.f32 %v155_v34, %v155_v34  ;;  %v194_v36 = vpop.f32.mrf.mxu1 }
  0xda   :  { %v221_v37 = vmul.f32 %v194_v36, %v194_v36 }
  0xdb   :  { %301 = vmatmul.f32.gmra.mxu2 %v220_v35 }
  0xdc   :  { %354 = vmatmul.f32.gmra.mxu3 %v221_v37 }
  0xe0   :  { %v158_v38 = vpop.f32.mrf.mxu0 }
  0xe1   :  { %v222_v39 = vmul.f32 %v158_v38, %v158_v38  ;;  %v197_v40 = vpop.f32.mrf.mxu1 }
  0xe2   :  { %v223_v41 = vmul.f32 %v197_v40, %v197_v40 }
  0xe3   :  { %304 = vmatmul.f32.gmra.mxu2 %v222_v39 }
  0xe4   :  { %357 = vmatmul.f32.gmra.mxu3 %v223_v41 }
  0xe8   :  { %v160_v42 = vpop.f32.mrf.mxu0 }
  0xe9   :  { %v224_v43 = vmul.f32 %v160_v42, %v160_v42  ;;  %v199_v44 = vpop.f32.mrf.mxu1 }
  0xea   :  { %v225_v45 = vmul.f32 %v199_v44, %v199_v44 }
  0xeb   :  { %307 = vmatmul.f32.gmra.mxu2 %v224_v43 }
  0xec   :  { %360 = vmatmul.f32.gmra.mxu3 %v225_v45 }
 0x110   :  { %v275_v60 = vpop.f32.mrf.mxu0 }
 0x111   :  { %v328_v61 = vpop.f32.mrf.mxu1 }
 0x112   :  { %v329_v63 = vadd.f32 %v328_v61, %v275_v60 }
 0x114   :  { %v364_v5 = vmax.f32 %v329_v63, 1e-05 }
 0x11e   :  { %v278_v46 = vpop.f32.mrf.mxu2 }
 0x11f   :  { %v331_v47 = vpop.f32.mrf.mxu3 }
 0x120   :  { %v332_v48 = vadd.f32 %v331_v47, %v278_v46 }
 0x122   :  { %v365_v0 = vmax.f32 %v332_v48, 1e-05 }
 0x124   :  { %536 = vlog2.f32 %v365_v0 }
 0x126   :  { %v281_v49 = vpop.f32.mrf.mxu2 }
 0x127   :  { %v334_v50 = vpop.f32.mrf.mxu3 }
 0x128   :  { %v335_v51 = vadd.f32 %v334_v50, %v281_v49 }
 0x12a   :  { %v366_v7 = vmax.f32 %v335_v51, 1e-05  ;;  %v537_v10 = vpop.eup %536 }
 0x12b   :  { %v379_v17 = vmul.f32 0.6931472, %v537_v10 }
 0x12e   :  { %v284_v52 = vpop.f32.mrf.mxu2 }
 0x12f   :  { %v337_v53 = vpop.f32.mrf.mxu3 }
 0x130   :  { %v338_v27 = vadd.f32 %v337_v53, %v284_v52 }
 0x132   :  { %v367_v35 = vmax.f32 %v338_v27, 1e-05 }
 0x136   :  { %v287_v54 = vpop.f32.mrf.mxu2 }
 0x137   :  { %v340_v55 = vpop.f32.mrf.mxu3 }
 0x138   :  { %v341_v29 = vadd.f32 %v340_v55, %v287_v54 }
 0x13a   :  { %v368_v37 = vmax.f32 %v341_v29, 1e-05 }
 0x13e   :  { %v290_v56 = vpop.f32.mrf.mxu2 }
 0x13f   :  { %v343_v57 = vpop.f32.mrf.mxu3 }
 0x140   :  { %v344_v43 = vadd.f32 %v343_v57, %v290_v56 }
 0x142   :  { %v369_v46 = vmax.f32 %v344_v43, 1e-05 }
 0x146   :  { %v293_v58 = vpop.f32.mrf.mxu2 }
 0x147   :  { %v346_v59 = vpop.f32.mrf.mxu3 }
 0x148   :  { %v347_v62 = vadd.f32 %v346_v59, %v293_v58 }
 0x14a   :  { %v370_v2 = vmax.f32 %v347_v62, 1e-05 }
 0x14c   :  { %538 = vlog2.f32 %v370_v2 }
 0x14e   :  { %v296_v1 = vpop.f32.mrf.mxu2 }
 0x14f   :  { %v349_v3 = vpop.f32.mrf.mxu3 }
 0x150   :  { %v350_v4 = vadd.f32 %v349_v3, %v296_v1 }
 0x152   :  { %v371_v6 = vmax.f32 %v350_v4, 1e-05  ;;  %v539_v12 = vpop.eup %538 }
 0x153   :  { %v389_v18 = vmul.f32 0.6931472, %v539_v12 }
 0x154   :  { %540 = vlog2.f32 %v371_v6 }
 0x155   :  { %542 = vlog2.f32 %v364_v5 }
 0x156   :  { %v299_v8 = vpop.f32.mrf.mxu2  ;;  %544 = vlog2.f32 %v366_v7 }
 0x157   :  { %v352_v9 = vpop.f32.mrf.mxu3 }
 0x158   :  { %v353_v11 = vadd.f32 %v352_v9, %v299_v8 }
 0x15a   :  { %v541_v13 = vpop.eup %540  ;;  %v372_v14 = vmax.f32 %v353_v11, 1e-05 }
 0x15b   :  { %v391_v15 = vmul.f32 0.6931472, %v541_v13  ;;  %v543_v16 = vpop.eup %542 }
 0x15c   :  { %546 = vlog2.f32 %v372_v14  ;;  %v377_v20 = vmul.f32 0.6931472, %v543_v16  ;;  %v545_v23 = vpop.eup %544 }
 0x15d   :  { %v401_v21 = vsub.f32 %v391_v15, %v379_v17  ;;  %v381_v28 = vmul.f32 0.6931472, %v545_v23 }
 0x15e   :  { %v302_v19 = vpop.f32.mrf.mxu2  ;;  %v400_v25 = vsub.f32 %v389_v18, %v377_v20 }
 0x15f   :  { %v355_v22 = vpop.f32.mrf.mxu3  ;;  %v407_v30 = vand.u32 2147483647, %v401_v21 }
 0x160   :  { %v356_v24 = vadd.f32 %v355_v22, %v302_v19  ;;  %v406_v33 = vand.u32 2147483647, %v400_v25 }
 0x162   :  { %v547_v26 = vpop.eup %546  ;;  %v373_v32 = vmax.f32 %v356_v24, 1e-05  ;;  %v412_v38 = vadd.f32 %v407_v30, %v406_v33 }
 0x163   :  { %v393_v31 = vmul.f32 0.6931472, %v547_v26 }
 0x164   :  { %548 = vlog2.f32 %v373_v32 }
 0x165   :  { %v402_v34 = vsub.f32 %v393_v31, %v381_v28  ;;  %550 = vlog2.f32 %v367_v35 }
 0x166   :  { %v305_v36 = vpop.f32.mrf.mxu2  ;;  %552 = vlog2.f32 %v368_v37 }
 0x167   :  { %v408_v39 = vand.u32 2147483647, %v402_v34  ;;  %v358_v40 = vpop.f32.mrf.mxu3 }
 0x168   :  { %v359_v41 = vadd.f32 %v358_v40, %v305_v36 }
 0x169   :  { %v413_v42 = vadd.f32 %v412_v38, %v408_v39 }
 0x16a   :  { %v374_v44 = vmax.f32 %v359_v41, 1e-05  ;;  %v549_v45 = vpop.eup %548 }
 0x16b   :  { %v551_v49 = vpop.eup %550  ;;  %v395_v52 = vmul.f32 0.6931472, %v549_v45 }
 0x16c   :  { %554 = vlog2.f32 %v374_v44  ;;  %v553_v51 = vpop.eup %552  ;;  %v383_v55 = vmul.f32 0.6931472, %v551_v49 }
 0x16d   :  { %556 = vlog2.f32 %v369_v46  ;;  %v385_v59 = vmul.f32 0.6931472, %v553_v51 }
 0x16e   :  { %v308_v47 = vpop.f32.mrf.mxu2  ;;  %v403_v60 = vsub.f32 %v395_v52, %v383_v55 }
 0x16f   :  { %v361_v48 = vpop.f32.mrf.mxu3 }
 0x170   :  { %v362_v50 = vadd.f32 %v361_v48, %v308_v47  ;;  %v409_v61 = vand.u32 2147483647, %v403_v60 }
 0x172   :  { %v555_v53 = vpop.eup %554  ;;  %v375_v54 = vmax.f32 %v362_v50, 1e-05  ;;  %v414_v2 = vadd.f32 %v413_v42, %v409_v61 }
 0x173   :  { %v397_v58 = vmul.f32 0.6931472, %v555_v53  ;;  %v557_v57 = vpop.eup %556 }
 0x174   :  { %558 = vlog2.f32 %v375_v54  ;;  %v387_v63 = vmul.f32 0.6931472, %v557_v57 }
 0x175   :  { %v404_v56 = vsub.f32 %v397_v58, %v385_v59 }
 0x177   :  { %v410_v0 = vand.u32 2147483647, %v404_v56 }
 0x179   :  { %v415_v4 = vadd.f32 %v414_v2, %v410_v0 }
 0x17a   :  { %v559_v62 = vpop.eup %558 }
 0x17b   :  { %v399_v1 = vmul.f32 0.6931472, %v559_v62 }
 0x17d   :  { %v405_v3 = vsub.f32 %v399_v1, %v387_v63 }
 0x17f   :  { %v411_v5 = vand.u32 2147483647, %v405_v3 }
 0x181   :  { %v416_v6 = vadd.f32 %v415_v4, %v411_v5 }
 0x183   :  { %417 = vst [vmem:[%s760_s3] sm:$0xff] %v416_v6 }

</bundles_post_ra>
